<compile_context>
chip_gen: v7x
topology: tpu7x:2x2x1
jax: 0.10.0
libtpu: 0.0.40
codegen_flags: <defaults>
</compile_context>

<pallas_src>
import functools

import jax
import jax.numpy as jnp
from jax import lax
from jax.experimental import pallas as pl
from jax.experimental.pallas import tpu as pltpu


def _round_up(x, m):
    return (x + m - 1) // m * m


def _pick_tk(kp, cap=2048):
    """Largest multiple-of-128 divisor of kp not exceeding cap (kp % 128 == 0)."""
    best, t = 128, 128
    while t <= min(kp, cap):
        if kp % t == 0:
            best = t
        t += 128
    return best


def _vmem_limit_bytes():
    # Size the scoped-VMEM limit against the actual chip generation:
    # v5e/v6e have 128 MiB physical VMEM, v7x only 64 MiB.
    try:
        cap = pltpu.get_tpu_info().vmem_capacity_bytes
        return min(96 * 1024 * 1024, int(cap * 0.7))
    except Exception:
        return 48 * 1024 * 1024   # conservative default that also fits v7x


_VMEM_LIMIT = _vmem_limit_bytes()


def _mosaic_params(*dim_sem):
    return pltpu.CompilerParams(dimension_semantics=dim_sem,
                                vmem_limit_bytes=_VMEM_LIMIT)


# ----------------------------------------------------------------------------
# Pallas matmul: bf16 MXU, f32 accumulation, fused bias / residual / ReLU
# ----------------------------------------------------------------------------

def _mm_kernel_single_k(*refs, relu, has_idn):
    # K fully resident -> no scratch accumulator, epilogue written directly.
    if has_idn:
        a_ref, b_ref, bias_ref, idn_ref, o_ref = refs
    else:
        a_ref, b_ref, bias_ref, o_ref = refs
        idn_ref = None
    y = jnp.dot(a_ref[...], b_ref[...], preferred_element_type=jnp.float32)
    y = y + bias_ref[...]
    if has_idn:
        y = y + idn_ref[...].astype(jnp.float32)
    if relu:
        y = jnp.maximum(y, 0.0)
    o_ref[...] = y.astype(o_ref.dtype)


def _mm_kernel_multi_k(*refs, relu, has_idn):
    if has_idn:
        a_ref, b_ref, bias_ref, idn_ref, o_ref, acc_ref = refs
    else:
        a_ref, b_ref, bias_ref, o_ref, acc_ref = refs
        idn_ref = None

    @pl.when(pl.program_id(2) == 0)
    def _():
        acc_ref[...] = jnp.zeros_like(acc_ref)

    acc_ref[...] += jnp.dot(a_ref[...], b_ref[...],
                            preferred_element_type=jnp.float32)

    @pl.when(pl.program_id(2) == pl.num_programs(2) - 1)
    def _():
        y = acc_ref[...] + bias_ref[...]
        if has_idn:
            y = y + idn_ref[...].astype(jnp.float32)
        if relu:
            y = jnp.maximum(y, 0.0)
        o_ref[...] = y.astype(o_ref.dtype)


def pallas_matmul(a, b, bias=None, idn=None, relu=False, out_dtype=jnp.float32):
    """a [M,K] @ b [K,N] (+ bias[N] + idn[M,N], optional ReLU) -> [M,N]."""
    M, K = a.shape
    K2, N = b.shape
    assert K == K2
    a = a.astype(jnp.bfloat16)
    b = b.astype(jnp.bfloat16)
    Kp = _round_up(K, 128)
    if Kp != K:
        a = jnp.pad(a, ((0, 0), (0, Kp - K)))
        b = jnp.pad(b, ((0, Kp - K), (0, 0)))

    tm = min(256, _round_up(M, 16))      # 16: bf16 sublane packing
    tn = min(256, _round_up(N, 128))
    # Keep the whole K dimension VMEM-resident whenever the tiles fit (true for
    # every matmul in this network, K <= 4608): removes the K grid axis, the
    # per-step overhead and the f32 accumulator round trip.
    tk = Kp if Kp <= 4608 else _pick_tk(Kp, 2048)

    if bias is None:
        bias = jnp.zeros((N,), jnp.float32)
    bias2d = bias.astype(jnp.float32).reshape(1, N)

    has_idn = idn is not None
    inputs = [a, b, bias2d]
    if has_idn:
        inputs.append(idn.astype(jnp.bfloat16))

    if tk == Kp:
        in_specs = [
            pl.BlockSpec((tm, Kp), lambda i, j: (i, 0)),
            pl.BlockSpec((Kp, tn), lambda i, j: (0, j)),
            pl.BlockSpec((1, tn), lambda i, j: (0, j)),
        ]
        if has_idn:
            in_specs.append(pl.BlockSpec((tm, tn), lambda i, j: (i, j)))
        return pl.pallas_call(
            functools.partial(_mm_kernel_single_k, relu=relu, has_idn=has_idn),
            out_shape=jax.ShapeDtypeStruct((M, N), out_dtype),
            grid_spec=pltpu.PrefetchScalarGridSpec(
                num_scalar_prefetch=0,
                grid=(pl.cdiv(M, tm), pl.cdiv(N, tn)),
                in_specs=in_specs,
                out_specs=pl.BlockSpec((tm, tn), lambda i, j: (i, j))),
            compiler_params=_mosaic_params("parallel", "parallel"),
        )(*inputs)

    in_specs = [
        pl.BlockSpec((tm, tk), lambda i, j, k: (i, k)),
        pl.BlockSpec((tk, tn), lambda i, j, k: (k, j)),
        pl.BlockSpec((1, tn), lambda i, j, k: (0, j)),
    ]
    if has_idn:
        in_specs.append(pl.BlockSpec((tm, tn), lambda i, j, k: (i, j)))
    return pl.pallas_call(
        functools.partial(_mm_kernel_multi_k, relu=relu, has_idn=has_idn),
        out_shape=jax.ShapeDtypeStruct((M, N), out_dtype),
        grid_spec=pltpu.PrefetchScalarGridSpec(
            num_scalar_prefetch=0,
            grid=(pl.cdiv(M, tm), pl.cdiv(N, tn), Kp // tk),
            in_specs=in_specs,
            out_specs=pl.BlockSpec((tm, tn), lambda i, j, k: (i, j)),
            scratch_shapes=[pltpu.VMEM((tm, tn), jnp.float32)]),
        compiler_params=_mosaic_params("parallel", "parallel", "arbitrary"),
    )(*inputs)


# ----------------------------------------------------------------------------
# Gridded elementwise / reduction kernels (BN+ReLU and 9-view maxpool kept as
# fallbacks; the fused stem kernel below is the primary path)
# ----------------------------------------------------------------------------

def _bn_act_kernel(x_ref, s_ref, b_ref, o_ref, *, relu):
    x = x_ref[...].astype(jnp.float32)
    y = x * s_ref[...] + b_ref[...]
    if relu:
        y = jnp.maximum(y, 0.0)
    o_ref[...] = y.astype(o_ref.dtype)


def batchnorm_act(x2d, bn, relu=True, eps=1e-5, out_dtype=jnp.bfloat16):
    gamma, beta, mean, var = bn
    scale = gamma * lax.rsqrt(var + eps)
    bias = beta - mean * scale
    R, C = x2d.shape
    tr = min(512, _round_up(R, 8))
    return pl.pallas_call(
        functools.partial(_bn_act_kernel, relu=relu),
        out_shape=jax.ShapeDtypeStruct((R, C), out_dtype),
        grid_spec=pltpu.PrefetchScalarGridSpec(
            num_scalar_prefetch=0,
            grid=(pl.cdiv(R, tr),),
            in_specs=[pl.BlockSpec((tr, C), lambda i: (i, 0)),
                      pl.BlockSpec((1, C), lambda i: (0, 0)),
                      pl.BlockSpec((1, C), lambda i: (0, 0))],
            out_specs=pl.BlockSpec((tr, C), lambda i: (i, 0))),
        compiler_params=_mosaic_params("parallel"),
    )(x2d, scale.astype(jnp.float32).reshape(1, C),
      bias.astype(jnp.float32).reshape(1, C))


def _max9_kernel(x_ref, o_ref):
    o_ref[...] = jnp.max(x_ref[...].astype(jnp.float32), axis=0).astype(o_ref.dtype)


def maxpool3x3s2(x):
    """Fallback 3x3/s2/p1 max pool on NHWC (input is post-ReLU, >= 0)."""
    B, H, W, C = x.shape
    Ho = (H + 2 - 3) // 2 + 1
    Wo = (W + 2 - 3) // 2 + 1
    xp = jnp.pad(x, ((0, 0), (1, 1), (1, 1), (0, 0)))
    views = []
    for di in range(3):
        for dj in range(3):
            views.append(lax.slice(
                xp, (0, di, dj, 0),
                (B, di + 2 * (Ho - 1) + 1, dj + 2 * (Wo - 1) + 1, C),
                (1, 2, 2, 1)))
    stacked = jnp.stack(views, axis=0).reshape(9, B * Ho * Wo, C)
    R = B * Ho * Wo
    tr = min(512, _round_up(R, 8))
    out = pl.pallas_call(
        _max9_kernel,
        out_shape=jax.ShapeDtypeStruct((R, C), x.dtype),
        grid_spec=pltpu.PrefetchScalarGridSpec(
            num_scalar_prefetch=0,
            grid=(pl.cdiv(R, tr),),
            in_specs=[pl.BlockSpec((9, tr, C), lambda i: (0, i, 0))],
            out_specs=pl.BlockSpec((tr, C), lambda i: (i, 0))),
        compiler_params=_mosaic_params("parallel"),
    )(stacked)
    return out.reshape(B, Ho, Wo, C)


def _gap_kernel(x_ref, o_ref):
    o_ref[...] = jnp.mean(x_ref[...].astype(jnp.float32), axis=1, keepdims=True)


def global_avgpool(x):
    """NHWC -> [B, C] (AdaptiveAvgPool2d((1,1))), one grid step per batch row."""
    B, H, W, C = x.shape
    out = pl.pallas_call(
        _gap_kernel,
        out_shape=jax.ShapeDtypeStruct((B, 1, C), jnp.float32),
        grid_spec=pltpu.PrefetchScalarGridSpec(
            num_scalar_prefetch=0,
            grid=(B,),
            in_specs=[pl.BlockSpec((1, H * W, C), lambda b: (b, 0, 0))],
            out_specs=pl.BlockSpec((1, 1, C), lambda b: (b, 0, 0))),
        compiler_params=_mosaic_params("parallel"),
    )(x.reshape(B, H * W, C))
    return out.reshape(B, C)


# ----------------------------------------------------------------------------
# Fused stem: BN + ReLU + 3x3/s2 max pool from a single VMEM-resident tile
# ----------------------------------------------------------------------------

def _stem_pool_kernel(x_ref, s_ref, b_ref, o_ref, ypad, *, h, w, ho, wo):
    # BN scale/bias + ReLU of the whole conv1 output image, then 3x3/s2 max
    # pool via strided reads of a padded VMEM scratch -- no intermediate HBM
    # round trip and no 9x shifted-view materialization.
    y = jnp.maximum(x_ref[0].astype(jnp.float32) * s_ref[...] + b_ref[...], 0.0)
    ypad[...] = jnp.zeros_like(ypad)        # zero pad == -inf pad since y >= 0
    ypad[1:h + 1, 1:w + 1, :] = y
    m = ypad[pl.ds(0, ho, stride=2), pl.ds(0, wo, stride=2), :]
    for di in range(3):
        for dj in range(3):
            if di == 0 and dj == 0:
                continue
            m = jnp.maximum(
                m, ypad[pl.ds(di, ho, stride=2), pl.ds(dj, wo, stride=2), :])
    o_ref[...] = m[None].astype(o_ref.dtype)


def stem_bn_relu_maxpool(x1, bn, eps=1e-5, out_dtype=jnp.bfloat16):
    B, H, W, C = x1.shape
    gamma, beta, mean, var = bn
    scale = gamma * lax.rsqrt(var + eps)
    bias = beta - mean * scale
    Ho = (H - 1) // 2 + 1
    Wo = (W - 1) // 2 + 1
    try:
        return pl.pallas_call(
            functools.partial(_stem_pool_kernel, h=H, w=W, ho=Ho, wo=Wo),
            out_shape=jax.ShapeDtypeStruct((B, Ho, Wo, C), out_dtype),
            grid_spec=pltpu.PrefetchScalarGridSpec(
                num_scalar_prefetch=0,
                grid=(B,),
                in_specs=[pl.BlockSpec((1, H, W, C), lambda b: (b, 0, 0, 0)),
                          pl.BlockSpec((1, C), lambda b: (0, 0)),
                          pl.BlockSpec((1, C), lambda b: (0, 0))],
                out_specs=pl.BlockSpec((1, Ho, Wo, C), lambda b: (b, 0, 0, 0)),
                scratch_shapes=[pltpu.VMEM((H + 2, W + 2, C), jnp.float32)]),
            compiler_params=_mosaic_params("parallel"),
        )(x1, scale.astype(jnp.float32).reshape(1, C),
          bias.astype(jnp.float32).reshape(1, C))
    except Exception:
        # TODO(synk): strided in-kernel pooling unsupported on this build ->
        # fall back to separate BN pass + 9-view max reduction.
        h2d = batchnorm_act(x1.reshape(-1, C), bn, relu=True).reshape(x1.shape)
        return maxpool3x3s2(h2d)


# ----------------------------------------------------------------------------
# Direct 3x3 conv (no HBM im2col): manual row-band DMA + 9-tap MXU accumulation
# ----------------------------------------------------------------------------

def _conv3x3_kernel(x_hbm, w_ref, bias_ref, o_ref, band, sem,
                    *, tr, wo, cin, cout, stride, relu):
    b = pl.program_id(0)
    r = pl.program_id(1)
    rows_in = (tr - 1) * stride + 3
    # Manual DMA of the (overlapping) padded input row band for this block of
    # output rows -- this is what lets us skip the HBM im2col materialization.
    cp = pltpu.make_async_copy(
        x_hbm.at[b, pl.ds(r * tr * stride, rows_in)], band, sem)
    cp.start()
    cp.wait()
    acc = jnp.zeros((tr * wo, cout), jnp.float32)
    for di in range(3):
        for dj in range(3):
            if stride == 1:
                a = band[di:di + tr, dj:dj + wo, :]
            else:
                a = band[pl.ds(di, tr, stride=stride),
                         pl.ds(dj, wo, stride=stride), :]
            acc = acc + jnp.dot(a.reshape(tr * wo, cin), w_ref[di * 3 + dj],
                                preferred_element_type=jnp.float32)
    y = acc + bias_ref[...]
    if relu:
        y = jnp.maximum(y, 0.0)
    o_ref[...] = y[None].astype(o_ref.dtype)


def conv3x3_direct(x, w, bn, stride, relu, out_dtype=jnp.bfloat16, eps=1e-5):
    """3x3 / pad 1 / stride {1,2} conv with eval-mode BN folded in.  The input
    stays in HBM; each grid step DMAs one row band into VMEM scratch."""
    B, H, W, Cin = x.shape
    O = w.shape[0]
    if bn is not None:
        gamma, beta, mean, var = bn
        scale = gamma * lax.rsqrt(var + eps)
        w = w * scale[:, None, None, None]
        bias = beta - mean * scale
    else:
        bias = jnp.zeros((O,), jnp.float32)
    w_taps = jnp.transpose(w, (2, 3, 1, 0)).reshape(9, Cin, O).astype(jnp.bfloat16)
    bias2d = bias.astype(jnp.float32).reshape(1, O)

    Ho = (H - 1) // stride + 1
    Wo = (W - 1) // stride + 1
    tr = 1
    for cand in (8, 4, 2, 1):
        if Ho % cand == 0:
            tr = cand
            break
    rows_in = (tr - 1) * stride + 3
    Wp = W + 2
    xpad = jnp.pad(x.astype(jnp.bfloat16), ((0, 0), (1, 1), (1, 1), (0, 0)))

    out = pl.pallas_call(
        functools.partial(_conv3x3_kernel, tr=tr, wo=Wo, cin=Cin, cout=O,
                          stride=stride, relu=relu),
        out_shape=jax.ShapeDtypeStruct((B, Ho * Wo, O), out_dtype),
        grid_spec=pltpu.PrefetchScalarGridSpec(
            num_scalar_prefetch=0,
            grid=(B, Ho // tr),
            in_specs=[pl.BlockSpec(memory_space=pl.ANY),
                      pl.BlockSpec((9, Cin, O), lambda b, r: (0, 0, 0)),
                      pl.BlockSpec((1, O), lambda b, r: (0, 0))],
            out_specs=pl.BlockSpec((1, tr * Wo, O), lambda b, r: (b, r, 0)),
            scratch_shapes=[pltpu.VMEM((rows_in, Wp, Cin), jnp.bfloat16),
                            pltpu.SemaphoreType.DMA(())]),
        compiler_params=_mosaic_params("parallel", "arbitrary"),
    )(xpad, w_taps, bias2d)
    return out.reshape(B, Ho, Wo, O)


# ----------------------------------------------------------------------------
# Conv (+ folded BN, fused bias/ReLU/residual)
# ----------------------------------------------------------------------------

def conv_bn(x, w, bn=None, stride=1, padding=0, relu=False, idn=None,
            out_dtype=jnp.bfloat16, eps=1e-5):
    """x: [B,H,W,Cin] NHWC (bf16); w: [O,Cin,kh,kw] (PyTorch layout); no conv bias.
    Eval-mode BN folded into w / bias; ReLU and residual-add fused in epilogue."""
    O, Cin, kh, kw = w.shape

    # Direct (im2col-free) path for all 3x3 convs.
    if (kh, kw) == (3, 3) and padding == 1 and idn is None and stride in (1, 2):
        try:
            return conv3x3_direct(x, w, bn, stride, relu, out_dtype, eps)
        except Exception:
            pass  # TODO(synk): direct-conv lowering unsupported here -> im2col fallback

    if bn is not None:
        gamma, beta, mean, var = bn
        scale = gamma * lax.rsqrt(var + eps)
        w = w * scale[:, None, None, None]
        bias = beta - mean * scale
    else:
        bias = None
    w2d = w.reshape(O, Cin * kh * kw).T

    B = x.shape[0]
    if kh == 1 and kw == 1 and padding == 0:
        xs = x[:, ::stride, ::stride, :] if stride > 1 else x
        _, Ho, Wo, _ = xs.shape
        a = xs.reshape(B * Ho * Wo, Cin)
    else:
        # TODO(synk): the 7x7 stem conv still uses im2col (Cin=3 makes a
        # per-tap direct conv MXU-inefficient); its patch blow-up is small.
        patches = lax.conv_general_dilated_patches(
            x, (kh, kw), (stride, stride),
            [(padding, padding), (padding, padding)],
            dimension_numbers=('NHWC', 'HWIO', 'NHWC'))
        _, Ho, Wo, CKK = patches.shape
        a = patches.reshape(B * Ho * Wo, CKK)

    idn2d = None if idn is None else idn.reshape(B * Ho * Wo, O)
    out = pallas_matmul(a, w2d, bias, idn=idn2d, relu=relu, out_dtype=out_dtype)
    return out.reshape(B, Ho, Wo, O)


# ----------------------------------------------------------------------------
# Bottleneck block (torchvision-style, expansion = 4)
# ----------------------------------------------------------------------------

def bottleneck(x, blk):
    s = blk['stride']
    out = conv_bn(x, blk['w1'], blk['bn1'], 1, 0, relu=True)
    out = conv_bn(out, blk['w2'], blk['bn2'], s, 1, relu=True)
    if 'wd' in blk:
        idn = conv_bn(x, blk['wd'], blk['bnd'], s, 0, relu=False)
    else:
        idn = x
    # conv3 + bn3 + residual add + ReLU, all in one matmul epilogue
    return conv_bn(out, blk['w3'], blk['bn3'], 1, 0, relu=True, idn=idn)


def apply_layer(x, layer_params):
    for blk in layer_params:
        x = bottleneck(x, blk)
    return x


# ----------------------------------------------------------------------------
# Parameter init (deterministic, mirrors the module's __init__)
# ----------------------------------------------------------------------------

def kaiming_conv(key, o, c, kh, kw):
    fan_out = o * kh * kw
    std = (2.0 / fan_out) ** 0.5
    return std * jax.random.normal(key, (o, c, kh, kw), jnp.float32)


def bn_params(c):
    # (gamma=1, beta=0, running_mean=0, running_var=1) -> eval-mode BN
    return (jnp.ones((c,), jnp.float32), jnp.zeros((c,), jnp.float32),
            jnp.zeros((c,), jnp.float32), jnp.ones((c,), jnp.float32))


def linear_params(key, in_f, out_f):
    k1, k2 = jax.random.split(key)
    bound = 1.0 / (in_f ** 0.5)
    w = jax.random.uniform(k1, (out_f, in_f), jnp.float32, -bound, bound)
    b = jax.random.uniform(k2, (out_f,), jnp.float32, -bound, bound)
    return w, b


def make_layer_params(key, inplanes, planes, blocks, stride):
    expansion = 4
    params = []
    keys = jax.random.split(key, blocks * 4)
    ki = 0
    for i in range(blocks):
        s = stride if i == 0 else 1
        blk = {
            'stride': s,
            'w1': kaiming_conv(keys[ki + 0], planes, inplanes, 1, 1),
            'bn1': bn_params(planes),
            'w2': kaiming_conv(keys[ki + 1], planes, planes, 3, 3),
            'bn2': bn_params(planes),
            'w3': kaiming_conv(keys[ki + 2], planes * expansion, planes, 1, 1),
            'bn3': bn_params(planes * expansion),
        }
        if i == 0 and (stride != 1 or inplanes != planes * expansion):
            blk['wd'] = kaiming_conv(keys[ki + 3], planes * expansion,
                                     inplanes, 1, 1)
            blk['bnd'] = bn_params(planes * expansion)
        ki += 4
        inplanes = planes * expansion
        params.append(blk)
    return params, inplanes


def init_params(key, layers=(1, 1, 1, 1), num_classes=2):
    keys = jax.random.split(key, 13)
    p = {}
    p['conv1'] = kaiming_conv(keys[0], 64, 3, 7, 7)
    p['bn1'] = bn_params(64)
    p['scale1'] = kaiming_conv(keys[1], 4, 64, 1, 1)
    inplanes = 64
    p['layer1'], inplanes = make_layer_params(keys[2], inplanes, 64, layers[0], 1)
    p['scale2'] = kaiming_conv(keys[3], 8, 256, 1, 1)
    p['dst1'] = linear_params(keys[4], 4 + 8, 1024 + 512)     # -> 1536-d cls token
    p['layer2'], inplanes = make_layer_params(keys[5], inplanes, 128, layers[1], 2)
    p['scale3'] = kaiming_conv(keys[6], 16, 512, 1, 1)
    p['layer3'], inplanes = make_layer_params(keys[7], inplanes, 256, layers[2], 2)
    p['scale4'] = kaiming_conv(keys[8], 32, 1024, 1, 1)
    p['dst2'] = linear_params(keys[9], 16 + 32, 256 + 128)    # -> 384-d cls token
    p['layer4'], inplanes = make_layer_params(keys[10], inplanes, 512, layers[3], 2)
    p['mlp'] = linear_params(keys[11], 3968, 1984)
    p['fc'] = linear_params(keys[12], 1984, num_classes)
    return p


# ----------------------------------------------------------------------------
# DST_block_IA stand-in
# ----------------------------------------------------------------------------

def dst_block_stub(gap_sm, gap_lg, w_sm_1x1, w_lg_1x1, lin):
    # TODO(synk): DST_block_IA source was not provided; stand-in = global
    # average pool of both scale maps + a Pallas linear projection.
    # The 1x1 scaleN convs are commuted with the GAP (both are linear, no bias)
    # and folded into the projection weight, so the 4..32-channel lane-sparse
    # scale maps are never materialized at full spatial resolution.
    w, b = lin                                            # (out_f, n_sm+n_lg)
    n_sm = w_sm_1x1.shape[0]
    p_sm = w_sm_1x1.reshape(n_sm, -1).T                   # (C_sm, n_sm)
    p_lg = w_lg_1x1.reshape(w_lg_1x1.shape[0], -1).T      # (C_lg, n_lg)
    wt = w.T.astype(jnp.float32)                          # (n_sm+n_lg, out_f)
    w_comb = jnp.concatenate([p_sm @ wt[:n_sm], p_lg @ wt[n_sm:]], axis=0)
    g = jnp.concatenate([gap_sm, gap_lg], axis=-1)        # (B, C_sm+C_lg)
    return pallas_matmul(g, w_comb, b, out_dtype=jnp.float32)


# ----------------------------------------------------------------------------
# Full forward pass (ResNet.forward)
# ----------------------------------------------------------------------------

def resnet_forward(params, x_nchw, fusion_flag=False):
    x = jnp.transpose(x_nchw, (0, 2, 3, 1)).astype(jnp.bfloat16)  # NCHW -> NHWC

    # conv1 WITHOUT bn1 folded: scale1Conv1 taps the pre-BN x_1.
    x1 = conv_bn(x, params['conv1'], None, stride=2, padding=3)
    # bn1 + relu + maxpool fused into one Pallas kernel.
    h = stem_bn_relu_maxpool(x1, params['bn1'])

    res1 = apply_layer(h, params['layer1'])
    # scaleN 1x1 convs commuted with the GAP inside the DST stub.
    g_x1 = global_avgpool(x1)                                      # [B, 64]
    g_r1 = global_avgpool(res1)                                    # [B, 256]
    cls_token1 = dst_block_stub(g_x1, g_r1, params['scale1'],
                                params['scale2'], params['dst1'])

    res2 = apply_layer(res1, params['layer2'])
    res3 = apply_layer(res2, params['layer3'])
    g_r2 = global_avgpool(res2)                                    # [B, 512]
    g_r3 = global_avgpool(res3)                                    # [B, 1024]
    cls_token2 = dst_block_stub(g_r2, g_r3, params['scale3'],
                                params['scale4'], params['dst2'])

    res4 = apply_layer(res3, params['layer4'])
    cls_token3 = global_avgpool(res4)                              # avgpool + flatten

    out = jnp.concatenate([cls_token1, cls_token2, cls_token3], axis=-1)  # [B,3968]
    # TODO(synk): mlp.fc1 and fc could be fused into a single pallas_call; kept
    # separate because the combined weight block is VMEM-heavy on v7x.
    mlp_w, mlp_b = params['mlp']
    out = pallas_matmul(out, mlp_w.T, mlp_b, out_dtype=jnp.float32)  # Mlp.fc1
    fc_w, fc_b = params['fc']
    out = pallas_matmul(out, fc_w.T, fc_b, out_dtype=jnp.float32)    # fc
    if not fusion_flag:
        return out
    return out, cls_token1, cls_token2, cls_token3


# ----------------------------------------------------------------------------

if __name__ == "__main__":
    key = jax.random.PRNGKey(0)
    kp, kx = jax.random.split(key)
    params = init_params(kp, layers=(1, 1, 1, 1), num_classes=2)
    # Small input (NCHW, like the PyTorch module): batch=2, 3 channels, 32x32.
    x = jax.random.normal(kx, (2, 3, 32, 32), jnp.float32)
    out = resnet_forward(params, x, fusion_flag=False)
    out = jax.block_until_ready(out)
    assert out.shape == (2, 2) and out.dtype == jnp.float32
    print("KERNEL_OK")
</pallas_src>

<mosaic_0001>
module attributes {stable_mosaic.version = 11 : i64} {
  func.func @_mm_kernel_single_k(%arg0: i32, %arg1: i32, %arg2: memref<256x256xbf16, #tpu.memory_space<vmem>>, %arg3: memref<256x128xbf16, #tpu.memory_space<vmem>>, %arg4: memref<1x128xf32, #tpu.memory_space<vmem>>, %arg5: memref<256x128xbf16, #tpu.memory_space<vmem>>) attributes {dimension_semantics = [#tpu.dimension_semantics<parallel>, #tpu.dimension_semantics<parallel>], iteration_bounds = array<i64: 2, 1>, scalar_prefetch = 0 : i64, scratch_operands = 0 : i64, tpu.core_type = #tpu.core_type<tc>, window_params = [{transform_indices = @transform_0, window_bounds = array<i64: 256, 256>}, {transform_indices = @transform_1, window_bounds = array<i64: 256, 128>}, {transform_indices = @transform_2, window_bounds = array<i64: 1, 128>}, {transform_indices = @transform_3, window_bounds = array<i64: 256, 128>}]} {
    %c0 = arith.constant 0 : index
    %c0_0 = arith.constant 0 : index
    %0 = vector.load %arg2[%c0, %c0_0] : memref<256x256xbf16, #tpu.memory_space<vmem>>, vector<256x256xbf16>
    %c0_1 = arith.constant 0 : index
    %c0_2 = arith.constant 0 : index
    %1 = vector.load %arg3[%c0_1, %c0_2] : memref<256x128xbf16, #tpu.memory_space<vmem>>, vector<256x128xbf16>
    %cst = arith.constant dense<0.000000e+00> : vector<256x128xf32>
    %2 = tpu.matmul %0, %1, %cst {dimension_numbers = #tpu.dot_dimension_numbers<[1], [0], [0], [1], [0, 0, 1, 1], [], []>} : vector<256x256xbf16>, vector<256x128xbf16>, vector<256x128xf32> -> vector<256x128xf32>
    %c0_3 = arith.constant 0 : index
    %c0_4 = arith.constant 0 : index
    %3 = vector.load %arg4[%c0_3, %c0_4] : memref<1x128xf32, #tpu.memory_space<vmem>>, vector<1x128xf32>
    %4 = vector.broadcast %3 : vector<1x128xf32> to vector<256x128xf32>
    %5 = arith.addf %2, %4 : vector<256x128xf32>
    %6 = arith.truncf %5 : vector<256x128xf32> to vector<256x128xbf16>
    %c0_5 = arith.constant 0 : index
    %c0_6 = arith.constant 0 : index
    %7 = vector.load %arg5[%c0_5, %c0_6] : memref<256x128xbf16, #tpu.memory_space<vmem>>, vector<256x128xbf16>
    tpu.vector_store %arg5[%c0_5, %c0_6], %6 {strides = array<i32>} : memref<256x128xbf16, #tpu.memory_space<vmem>>, vector<256x128xbf16>,
    return
  }
  func.func @transform_0(%arg0: i32, %arg1: i32) -> (i32, i32) {
    %c0_i32 = arith.constant 0 : i32
    %c0_i32_0 = arith.constant 0 : i32
    return %arg0, %c0_i32 : i32, i32
  }
  func.func @transform_1(%arg0: i32, %arg1: i32) -> (i32, i32) {
    %c0_i32 = arith.constant 0 : i32
    %c0_i32_0 = arith.constant 0 : i32
    return %c0_i32, %arg1 : i32, i32
  }
  func.func @transform_2(%arg0: i32, %arg1: i32) -> (i32, i32) {
    %c0_i32 = arith.constant 0 : i32
    %c0_i32_0 = arith.constant 0 : i32
    return %c0_i32, %arg1 : i32, i32
  }
  func.func @transform_3(%arg0: i32, %arg1: i32) -> (i32, i32) {
    %c0_i32 = arith.constant 0 : i32
    return %arg0, %arg1 : i32, i32
  }
}

</mosaic_0001>

<bundles_post_ra>
// kernel: tpu_custom_call.1
= control target key start
LH: loop header
LB: loop body
LE: loop exit
PB: predicated region body
PF: predicated region fallthrough
CT: control target
= control target key end

     0   :  { %8 = vsyncpa [#allocation3], 0  ;;  %s1847_s0 = inlined_call_operand.hbm [shape: bf16[512,256], index: 0, kind: input, shape index: {}]   ;;  %s1848_s1 = inlined_call_operand.vmem [shape: bf16[256,64], index: 1, kind: input, shape index: {}]   ;;  %s1849_s2 = inlined_call_operand.vmem [shape: f32[1,64], index: 2, kind: input, shape index: {}]   ;;  %s1850_s3 = inlined_call_operand.vmem [shape: bf16[512,64], index: 3, kind: output, shape index: {}]  }
   0x1   :  { %10 = vsyncpa [#allocation3 + $0x1], 0  ;;  %s1587_s12 = smov 0   ;;  %s1589_s13 = smov 0  }
   0x2   :  { %s1591_s14 = smov 0   ;;  %s1593_s15 = smov 0  }
   0x3   :  { %s1595_s16 = smov 0   ;;  %s1597_s17 = smov 0  }
   0x4 LB: > { %s1007_s18 = sadd.s32 4294967295, %s1562_s17   ;;  %s28_s19 = sadd.s32 1, %s1558_s16  ;;  %s1562_s17 = sphi %s1597_s17, %s16_s17   ;;  %s1558_s16 = sphi %s1595_s16, %s1858_s16   ;;  %s1554_s15 = sphi %s1593_s15, %s1857_s15   ;;  %s1550_s14 = sphi %s1591_s14, %s1856_s14   ;;  %s1546_s13 = sphi %s1589_s13, %s1855_s13   ;;  %s1542_s12 = sphi %s1587_s12, %s1854_s12  }
   0x5   : > { %p30_p0 = scmp.ge.s32.totalorder %s28_s19, 2  ;;  %s35_s20 = sadd.s32 1, %s1550_s14 }
   0x6   : > { %p42_p1 = scmp.ne.s32.totalorder %s1550_s14, %s1546_s13  ;;  %p43_p2 = scmp.eq.s32.totalorder %s1562_s17, 0 }
   0x7   : > { %s1860_s19 = smov (%p30_p0, %s28_s19), 0  ;;  %p48_p4 = scmp.ne.s32.totalorder %s1546_s13, %s1542_s12 }
   0x8   : > { %p1623_p3 = por %p43_p2, %p42_p1  ;;  %s32_s22 = ssub.s32 %s1558_s16, %s1860_s19 }
   0x9   : > { %p49_p5 = scmp.eq.s32.totalorder %s1007_s18, 0  ;;  %p33_p6 = scmp.eq.s32.totalorder %s32_s22, 0 }
   0xa   : > { %p1367_p8 = scmp.lt.s32.totalorder %s1562_s17, 2  ;;  %s165_s25 = sand.u32 1, %s1550_s14  }
   0xb   : > { %p1630_p7 = por %p49_p5, %p48_p4  ;;  %s1105_s26 = sshll.u32 %s1558_s16, 12 }
   0xc   : > { %s1636_s24 = scalar_select %p33_p6, %s1550_s14, %s35_s20  }
   0xd   : > { %s1013_s27 = sshll.u32 %s165_s25, 8  ;;  %s1643_s30 = scalar_lea.hbm %s1847_s0, %s1105_s26 }
   0xe   : > { %s169_s4 = scalar_lea.vmem [#allocation2], %s1013_s27  ;;  %p1647_p9 = pnand %p1367_p8, %p1623_p3 }
   0xf   : > { %s177_s5 = sshll.u32 %s169_s4, 4  ;;  %s1653_s7 = scalar_lea.sflag [#allocation3], %s165_s25  ;;  %s1651_s5 = int_to_ptr.vmem [resolvable:$true] %s177_s5 }
  0x10   : > { %s1482_s8 = scalar_lea.hbm %s1643_s30, 4096  ;;  %p1484_p11 = pneg %p1647_p9 }
  0x11   : > { %p1483_p10 = scmp.ne.s32.totalorder %s1643_s30, %s1482_s8  ;;  %s1487_s11 = scalar_lea.hbm %s1847_s0, 8192 }
  0x12   : > { %p1488_p0 = scmp.lt.u32.totalorder %s1643_s30, %s1847_s0  ;;  %p1489_p1 = scmp.lt.u32.totalorder %s1487_s11, %s1482_s8 }
  0x13   : > { %p1485_p12 = pnand %p1484_p11, %p1483_p10  ;;  %p1491_p3 = scmp.lt.u32.totalorder %s1482_s8, %s1643_s30 }
  0x14   : > { %p1490_p2 = por %p1489_p1, %p1488_p0 }
  0x15   : > { %p1486_p13 = pneg %p1485_p12 }
  0x16   : > { %p1492_p4 = por %p1491_p3, %p1490_p2 }
  0x18   : > { %p1493_p5 = pnand %p1492_p4, %p1486_p13 }
  0x1a   : > { %1496 = shalt.err (!%p1493_p5)
}
  0x1b   : > { %s1497_s20 = scalar_lea.vmem %s1651_s5, 4096  ;;  %s1564_s21 = smov [#allocation2]  }
  0x1c   : > { %p1498_p6 = scmp.ne.s32.totalorder %s1651_s5, %s1497_s20  ;;  %s1502_s22 = sshll.u32 %s1564_s21, 4  ;;  %s1503_s22 = int_to_ptr.vmem [resolvable:$false] %s1502_s22 }
  0x1d   : > { %s1504_s25 = scalar_lea.vmem %s1503_s22, 8192  ;;  %p1505_p12 = scmp.lt.s32.totalorder %s1651_s5, %s1503_s22 }
  0x1e   : > { %p1500_p8 = pnand %p1498_p6, %p1484_p11  ;;  %p1506_p0 = scmp.lt.s32.totalorder %s1504_s25, %s1497_s20 }
  0x20   : > { %p1501_p10 = pneg %p1500_p8  ;;  %p1507_p1 = por %p1506_p0, %p1505_p12 }
  0x22   : > { %p1508_p2 = pnand %p1507_p1, %p1501_p10 }
  0x24   : > { %1511 = shalt.err (!%p1508_p2)
}
  0x25   : > { %s1565_s26 = smov 128   ;;  %s1566_s27 = smov 8  }
  0x26   : > { %1366 = dma.hbm_to_vmem [thread:$0]  (!%p1647_p9), %s1643_s30, 4096, %s1651_s5, %s1653_s7, %s1565_s26, %s1565_s26, %s1566_s27  }
  0x27   : > { %p1017_p11 = scmp.ge.s32.totalorder %s1562_s17, 1  ;;  %p185_p13 = scmp.lt.s32.totalorder %s1562_s17, 3 }
  0x29   : > { %p186_p3 = pnand %p1017_p11, %p185_p13 }
  0x2a   : > { %s191_s28 = sand.u32 (!%p186_p3), 1, %s1546_s13  }
  0x2b   : > { %189 = sbr.rel (%p186_p3) target bundleno = 362 (0x16a), region = 32  ;;  %s1018_s29 = sshll.u32 (!%p186_p3), %s191_s28, 8 }
  0x2c   : > { %s192_s4 = scalar_lea.sflag (!%p186_p3), [#allocation3], %s191_s28  ;;  %s1684_s8 = scalar_lea.vmem (!%p186_p3), [#allocation2], %s1018_s29 }
  0x32   : > { %1537 = dma.done.wait (%p1630_p7), %s192_s4, 4096  }
  0x33   : > { %1539 = vsyncadd (%p1630_p7), %s192_s4, 4294963200  ;;  %v1418_v0 = vld [vmem:[%s1848_s1 + $0x40] sm:$0xff]   ;;  %v1420_v2 = vld [vmem:[%s1848_s1 + $0x48] sm:$0xff]   ;;  %s1019_s25 = sshll.u32 %s1554_s15, 5 }
  0x34   : > { %v1419_v1 = vld [vmem:[%s1848_s1] sm:$0xff]   ;;  %1233 = vmatprep.subr.bf16.mxu0 %v1418_v0  ;;  %1345 = vmatprep.subr.bf16.mxu1 %v1418_v0  ;;  %v1421_v3 = vld [vmem:[%s1848_s1 + $0x8] sm:$0xff]   ;;  %v1422_v4 = vld [vmem:[%s1848_s1 + $0x50] sm:$0xff]   ;;  %p237_p7 = scmp.lt.s32.totalorder %s1019_s25, 63 }
  0x35   : > { %1234 = vmatpush3.bf16.msra.mxu0 %v1419_v1  ;;  %1353 = vmatpush3.bf16.msra.mxu1 %v1419_v1  ;;  %v1423_v5 = vld [vmem:[%s1848_s1 + $0x10] sm:$0xff]   ;;  %v1424_v6 = vld [vmem:[%s1848_s1 + $0x58] sm:$0xff]   ;;  %v1426_v8 = vld [vmem:[%s1848_s1 + $0x60] sm:$0xff]  }
  0x36   : > { %1235 = vmatprep.subr.bf16.mxu0 %v1420_v2  ;;  %1346 = vmatprep.subr.bf16.mxu1 %v1420_v2  ;;  %v1425_v7 = vld [vmem:[%s1848_s1 + $0x18] sm:$0xff]   ;;  %v1427_v9 = vld [vmem:[%s1848_s1 + $0x20] sm:$0xff]   ;;  %v1428_v10 = vld [vmem:[%s1848_s1 + $0x68] sm:$0xff]   ;;  %s1862_s25 = smov (!%p237_p7, %s1019_s25), 63 }
  0x37   : > { %v1436_v11 = vld [vmem:[%s1684_s8 + $0x4] ss:$8 sps:$4 sm:$0xff]   ;;  %v1430_v14 = vld [vmem:[%s1848_s1 + $0x70] sm:$0xff]   ;;  %v1432_v16 = vld [vmem:[%s1848_s1 + $0x78] sm:$0xff]  }
  0x38   : > { %v1439_v12 = vld [vmem:[%s1684_s8 + $0x84] ss:$8 sps:$4 sm:$0xff]   ;;  %605 = vmatprep.mubr.bf16.mxu0 %v1436_v11  ;;  %v1431_v15 = vld [vmem:[%s1848_s1 + $0x30] sm:$0xff]   ;;  %v1433_v17 = vld [vmem:[%s1848_s1 + $0x38] sm:$0xff]  }
  0x39   : > { %1236 = vmatpush3.bf16.msra.mxu0 %v1421_v3  ;;  %1354 = vmatpush3.bf16.msra.mxu1 %v1421_v3  ;;  %v1429_v13 = vld [vmem:[%s1848_s1 + $0x28] sm:$0xff]   ;;  %v1440_v20 = vld [vmem:[%s1684_s8 + $0x14] ss:$8 sps:$4 sm:$0xff]   ;;  %v1444_v22 = vld [vmem:[%s1684_s8 + $0x10] ss:$8 sps:$4 sm:$0xff]  }
  0x3a   : > { %1237 = vmatprep.subr.bf16.mxu0 %v1422_v4  ;;  %1347 = vmatprep.subr.bf16.mxu1 %v1422_v4  ;;  %v1434_v18 = vld [vmem:[%s1684_s8] ss:$8 sps:$4 sm:$0xff]   ;;  %v1442_v21 = vld [vmem:[%s1684_s8 + $0x94] ss:$8 sps:$4 sm:$0xff]   ;;  %v1445_v23 = vld [vmem:[%s1684_s8 + $0x90] ss:$8 sps:$4 sm:$0xff]  }
  0x3b   : > { %669 = vmatprep.mubr.bf16.mxu1 %v1439_v12  ;;  %v1437_v19 = vld [vmem:[%s1684_s8 + $0x80] ss:$8 sps:$4 sm:$0xff]   ;;  %v1446_v24 = vld [vmem:[%s1684_s8 + $0x24] ss:$8 sps:$4 sm:$0xff]   ;;  %v1452_v28 = vld [vmem:[%s1684_s8 + $0x34] ss:$8 sps:$4 sm:$0xff]  }
  0x3c   : > { %v1448_v25 = vld [vmem:[%s1684_s8 + $0xa4] ss:$8 sps:$4 sm:$0xff]   ;;  %v1450_v26 = vld [vmem:[%s1684_s8 + $0x20] ss:$8 sps:$4 sm:$0xff]   ;;  %v1454_v29 = vld [vmem:[%s1684_s8 + $0xb4] ss:$8 sps:$4 sm:$0xff]  }
  0x3d   : > { %1238 = vmatpush3.bf16.msra.mxu0 %v1423_v5  ;;  %1355 = vmatpush3.bf16.msra.mxu1 %v1423_v5  ;;  %v1451_v27 = vld [vmem:[%s1684_s8 + $0xa0] ss:$8 sps:$4 sm:$0xff]   ;;  %v1456_v30 = vld [vmem:[%s1684_s8 + $0x30] ss:$8 sps:$4 sm:$0xff]   ;;  %v1458_v32 = vld [vmem:[%s1684_s8 + $0x44] ss:$8 sps:$4 sm:$0xff]  }
  0x3e   : > { %1239 = vmatprep.subr.bf16.mxu0 %v1424_v6  ;;  %1348 = vmatprep.subr.bf16.mxu1 %v1424_v6  ;;  %v1457_v31 = vld [vmem:[%s1684_s8 + $0xb0] ss:$8 sps:$4 sm:$0xff]   ;;  %v1460_v33 = vld [vmem:[%s1684_s8 + $0xc4] ss:$8 sps:$4 sm:$0xff]   ;;  %v1462_v34 = vld [vmem:[%s1684_s8 + $0x40] ss:$8 sps:$4 sm:$0xff]  }
  0x3f   : > { %v1463_v35 = vld [vmem:[%s1684_s8 + $0xc0] ss:$8 sps:$4 sm:$0xff]   ;;  %v1464_v36 = vld [vmem:[%s1684_s8 + $0x54] ss:$8 sps:$4 sm:$0xff]   ;;  %v1468_v38 = vld [vmem:[%s1684_s8 + $0x50] ss:$8 sps:$4 sm:$0xff]  }
  0x40   : > { %v1466_v37 = vld [vmem:[%s1684_s8 + $0xd4] ss:$8 sps:$4 sm:$0xff]   ;;  %v1469_v39 = vld [vmem:[%s1684_s8 + $0xd0] ss:$8 sps:$4 sm:$0xff]   ;;  %v1470_v40 = vld [vmem:[%s1684_s8 + $0x64] ss:$8 sps:$4 sm:$0xff]  }
  0x41   : > { %1240 = vmatpush3.bf16.msra.mxu0 %v1425_v7  ;;  %1356 = vmatpush3.bf16.msra.mxu1 %v1425_v7  ;;  %v1472_v41 = vld [vmem:[%s1684_s8 + $0xe4] ss:$8 sps:$4 sm:$0xff]   ;;  %v1474_v42 = vld [vmem:[%s1684_s8 + $0x60] ss:$8 sps:$4 sm:$0xff]   ;;  %v1476_v44 = vld [vmem:[%s1684_s8 + $0x74] ss:$8 sps:$4 sm:$0xff]  }
  0x42   : > { %1241 = vmatprep.subr.bf16.mxu0 %v1426_v8  ;;  %1349 = vmatprep.subr.bf16.mxu1 %v1426_v8  ;;  %v1475_v43 = vld [vmem:[%s1684_s8 + $0xe0] ss:$8 sps:$4 sm:$0xff]   ;;  %v1478_v45 = vld [vmem:[%s1684_s8 + $0xf4] ss:$8 sps:$4 sm:$0xff]   ;;  %v1480_v46 = vld [vmem:[%s1684_s8 + $0x70] ss:$8 sps:$4 sm:$0xff]  }
  0x43   : > { %v1481_v47 = vld [vmem:[%s1684_s8 + $0xf0] ss:$8 sps:$4 sm:$0xff]   ;;  %v1774_v56 = vld [vmem:[%s1849_s2] ss:$0 sm:$0xff]  ;;  %s1020_s8 = sshll.u32 %s1862_s25, 2 }
  0x44   : > { %s1783_s29 = scalar_lea.vmem %s1850_s3, %s1020_s8 }
  0x45   : > { %1242 = vmatpush3.bf16.msra.mxu0 %v1427_v9  ;;  %1357 = vmatpush3.bf16.msra.mxu1 %v1427_v9 }
  0x46   : > { %1243 = vmatprep.subr.bf16.mxu0 %v1428_v10  ;;  %1350 = vmatprep.subr.bf16.mxu1 %v1428_v10 }
  0x49   : > { %1244 = vmatpush3.bf16.msra.mxu0 %v1429_v13  ;;  %1358 = vmatpush3.bf16.msra.mxu1 %v1429_v13 }
  0x4a   : > { %1245 = vmatprep.subr.bf16.mxu0 %v1430_v14  ;;  %1351 = vmatprep.subr.bf16.mxu1 %v1430_v14 }
  0x4d   : > { %1246 = vmatpush3.bf16.msra.mxu0 %v1431_v15  ;;  %1359 = vmatpush3.bf16.msra.mxu1 %v1431_v15 }
  0x4e   : > { %1247 = vmatprep.subr.bf16.mxu0 %v1432_v16  ;;  %1352 = vmatprep.subr.bf16.mxu1 %v1432_v16 }
  0x51   : > { %1248 = vmatpush3.bf16.msra.mxu0 %v1433_v17  ;;  %1360 = vmatpush3.bf16.msra.mxu1 %v1433_v17 }
  0x54   : > { %606 = vmatmul.mubr.bf16.vlgmr.msra.gmra.mrb[0].mxu0 %v1434_v18  ;;  %670 = vmatmul.mubr.bf16.vlgmr.msra.gmra.mrb[0].mxu1 %v1437_v19 }
  0x55   : > { %613 = vmatprep.mubr.bf16.mxu0 %v1440_v20  ;;  %677 = vmatprep.mubr.bf16.mxu1 %v1442_v21 }
  0x5c   : > { %614 = vmatmul.mubr.bf16.gmra.mrb[4].mxu0 %v1444_v22  ;;  %678 = vmatmul.mubr.bf16.gmra.mrb[4].mxu1 %v1445_v23 }
  0x5d   : > { %621 = vmatprep.mubr.bf16.mxu0 %v1446_v24  ;;  %685 = vmatprep.mubr.bf16.mxu1 %v1448_v25 }
  0x64   : > { %622 = vmatmul.mubr.bf16.gmra.mrb[8].mxu0 %v1450_v26  ;;  %686 = vmatmul.mubr.bf16.gmra.mrb[8].mxu1 %v1451_v27 }
  0x65   : > { %629 = vmatprep.mubr.bf16.mxu0 %v1452_v28  ;;  %693 = vmatprep.mubr.bf16.mxu1 %v1454_v29 }
  0x6c   : > { %630 = vmatmul.mubr.bf16.gmra.mrb[12].mxu0 %v1456_v30  ;;  %694 = vmatmul.mubr.bf16.gmra.mrb[12].mxu1 %v1457_v31 }
  0x6d   : > { %637 = vmatprep.mubr.bf16.mxu0 %v1458_v32  ;;  %701 = vmatprep.mubr.bf16.mxu1 %v1460_v33 }
  0x74   : > { %638 = vmatmul.mubr.bf16.gmra.mrb[16].mxu0 %v1462_v34  ;;  %702 = vmatmul.mubr.bf16.gmra.mrb[16].mxu1 %v1463_v35 }
  0x75   : > { %645 = vmatprep.mubr.bf16.mxu0 %v1464_v36  ;;  %709 = vmatprep.mubr.bf16.mxu1 %v1466_v37 }
  0x7c   : > { %646 = vmatmul.mubr.bf16.gmra.mrb[20].mxu0 %v1468_v38  ;;  %710 = vmatmul.mubr.bf16.gmra.mrb[20].mxu1 %v1469_v39 }
  0x7d   : > { %653 = vmatprep.mubr.bf16.mxu0 %v1470_v40  ;;  %717 = vmatprep.mubr.bf16.mxu1 %v1472_v41 }
  0x84   : > { %654 = vmatmul.mubr.bf16.gmra.mrb[24].mxu0 %v1474_v42  ;;  %718 = vmatmul.mubr.bf16.gmra.mrb[24].mxu1 %v1475_v43 }
  0x85   : > { %661 = vmatprep.mubr.bf16.mxu0 %v1476_v44  ;;  %725 = vmatprep.mubr.bf16.mxu1 %v1478_v45 }
  0x8c   : > { %662 = vmatmul.mubr.bf16.gmra.mrb[28].mxu0 %v1480_v46  ;;  %726 = vmatmul.mubr.bf16.gmra.mrb[28].mxu1 %v1481_v47 }
 0x127   : > { %v1249_v48 = vpop.f32.mrb[0].mxu0  ;;  %v1297_v49 = vpop.f32.mrb[0].mxu1 }
 0x128   : > { %v1250_v50 = vpop.f32.mrb[1].mxu0  ;;  %v1298_v51 = vpop.f32.mrb[1].mxu1 }
 0x129   : > { %v1251_v52 = vadd.f32 %v1250_v50, %v1249_v48  ;;  %v1299_v53 = vadd.f32 %v1298_v51, %v1297_v49  ;;  %v1252_v54 = vpop.f32.mrb[2].mxu0  ;;  %v1300_v55 = vpop.f32.mrb[2].mxu1 }
 0x12a   : > { %v1253_v57 = vpop.f32.mrb[3].mxu0  ;;  %v1301_v58 = vpop.f32.mrb[3].mxu1 }
 0x12b   : > { %v1254_v59 = vadd.f32 %v1253_v57, %v1252_v54  ;;  %v1302_v60 = vadd.f32 %v1301_v58, %v1300_v55  ;;  %v608_v61 = vadd.f32 %v1251_v52, %v1774_v56  ;;  %v672_v62 = vadd.f32 %v1299_v53, %v1774_v56 }
 0x12d   : > { %v611_v63 = vadd.f32 %v1254_v59, %v1774_v56  ;;  %v675_v0 = vadd.f32 %v1302_v60, %v1774_v56 }
 0x12f   : > { %v1141_v1 = vpack.c.bf16 %v611_v63, %v608_v61  ;;  %v1181_v2 = vpack.c.bf16 %v675_v0, %v672_v62  ;;  %v1255_v3 = vpop.f32.mrb[4].mxu0  ;;  %v1303_v4 = vpop.f32.mrb[4].mxu1 }
 0x130   : > { %v1256_v5 = vpop.f32.mrb[5].mxu0  ;;  %v1304_v6 = vpop.f32.mrb[5].mxu1 }
 0x131   : > { %1142 = vst [vmem:[%s1783_s29] sm:$0xff] %v1141_v1   ;;  %1225 = vst [vmem:[%s1783_s29 + $0x40] sm:$0xff] %v1181_v2   ;;  %v1257_v7 = vadd.f32 %v1256_v5, %v1255_v3  ;;  %v1305_v8 = vadd.f32 %v1304_v6, %v1303_v4  ;;  %v1258_v9 = vpop.f32.mrb[6].mxu0  ;;  %v1306_v10 = vpop.f32.mrb[6].mxu1 }
 0x132   : > { %v1259_v11 = vpop.f32.mrb[7].mxu0  ;;  %v1307_v12 = vpop.f32.mrb[7].mxu1 }
 0x133   : > { %v1260_v13 = vadd.f32 %v1259_v11, %v1258_v9  ;;  %v1308_v14 = vadd.f32 %v1307_v12, %v1306_v10  ;;  %v616_v15 = vadd.f32 %v1257_v7, %v1774_v56  ;;  %v680_v16 = vadd.f32 %v1305_v8, %v1774_v56 }
 0x135   : > { %v619_v17 = vadd.f32 %v1260_v13, %v1774_v56  ;;  %v683_v18 = vadd.f32 %v1308_v14, %v1774_v56 }
 0x137   : > { %v1146_v19 = vpack.c.bf16 %v619_v17, %v616_v15  ;;  %v1186_v20 = vpack.c.bf16 %v683_v18, %v680_v16  ;;  %v1261_v21 = vpop.f32.mrb[8].mxu0  ;;  %v1309_v22 = vpop.f32.mrb[8].mxu1 }
 0x138   : > { %v1262_v23 = vpop.f32.mrb[9].mxu0  ;;  %v1310_v24 = vpop.f32.mrb[9].mxu1 }
 0x139   : > { %1218 = vst [vmem:[%s1783_s29 + $0x8] sm:$0xff] %v1146_v19   ;;  %1226 = vst [vmem:[%s1783_s29 + $0x48] sm:$0xff] %v1186_v20   ;;  %v1263_v25 = vadd.f32 %v1262_v23, %v1261_v21  ;;  %v1311_v26 = vadd.f32 %v1310_v24, %v1309_v22  ;;  %v1264_v27 = vpop.f32.mrb[10].mxu0  ;;  %v1312_v28 = vpop.f32.mrb[10].mxu1 }
 0x13a   : > { %v1265_v29 = vpop.f32.mrb[11].mxu0  ;;  %v1313_v30 = vpop.f32.mrb[11].mxu1 }
 0x13b   : > { %v1266_v31 = vadd.f32 %v1265_v29, %v1264_v27  ;;  %v1314_v32 = vadd.f32 %v1313_v30, %v1312_v28  ;;  %v624_v33 = vadd.f32 %v1263_v25, %v1774_v56  ;;  %v688_v34 = vadd.f32 %v1311_v26, %v1774_v56 }
 0x13d   : > { %v627_v35 = vadd.f32 %v1266_v31, %v1774_v56  ;;  %v691_v36 = vadd.f32 %v1314_v32, %v1774_v56 }
 0x13f   : > { %v1151_v37 = vpack.c.bf16 %v627_v35, %v624_v33  ;;  %v1191_v38 = vpack.c.bf16 %v691_v36, %v688_v34  ;;  %v1267_v39 = vpop.f32.mrb[12].mxu0  ;;  %v1315_v40 = vpop.f32.mrb[12].mxu1 }
 0x140   : > { %v1268_v41 = vpop.f32.mrb[13].mxu0  ;;  %v1316_v42 = vpop.f32.mrb[13].mxu1 }
 0x141   : > { %1219 = vst [vmem:[%s1783_s29 + $0x10] sm:$0xff] %v1151_v37   ;;  %1227 = vst [vmem:[%s1783_s29 + $0x50] sm:$0xff] %v1191_v38   ;;  %v1269_v43 = vadd.f32 %v1268_v41, %v1267_v39  ;;  %v1317_v44 = vadd.f32 %v1316_v42, %v1315_v40  ;;  %v1270_v45 = vpop.f32.mrb[14].mxu0  ;;  %v1318_v46 = vpop.f32.mrb[14].mxu1 }
 0x142   : > { %v1271_v47 = vpop.f32.mrb[15].mxu0  ;;  %v1319_v48 = vpop.f32.mrb[15].mxu1 }
 0x143   : > { %v1272_v49 = vadd.f32 %v1271_v47, %v1270_v45  ;;  %v1320_v50 = vadd.f32 %v1319_v48, %v1318_v46  ;;  %v632_v51 = vadd.f32 %v1269_v43, %v1774_v56  ;;  %v696_v52 = vadd.f32 %v1317_v44, %v1774_v56 }
 0x145   : > { %v635_v53 = vadd.f32 %v1272_v49, %v1774_v56  ;;  %v699_v54 = vadd.f32 %v1320_v50, %v1774_v56 }
 0x147   : > { %v1156_v55 = vpack.c.bf16 %v635_v53, %v632_v51  ;;  %v1196_v57 = vpack.c.bf16 %v699_v54, %v696_v52  ;;  %v1273_v58 = vpop.f32.mrb[16].mxu0  ;;  %v1321_v59 = vpop.f32.mrb[16].mxu1 }
 0x148   : > { %v1274_v60 = vpop.f32.mrb[17].mxu0  ;;  %v1322_v61 = vpop.f32.mrb[17].mxu1 }
 0x149   : > { %1220 = vst [vmem:[%s1783_s29 + $0x18] sm:$0xff] %v1156_v55   ;;  %1228 = vst [vmem:[%s1783_s29 + $0x58] sm:$0xff] %v1196_v57   ;;  %v1275_v62 = vadd.f32 %v1274_v60, %v1273_v58  ;;  %v1323_v63 = vadd.f32 %v1322_v61, %v1321_v59  ;;  %v1276_v0 = vpop.f32.mrb[18].mxu0  ;;  %v1324_v1 = vpop.f32.mrb[18].mxu1 }
 0x14a   : > { %v1277_v2 = vpop.f32.mrb[19].mxu0  ;;  %v1325_v3 = vpop.f32.mrb[19].mxu1 }
 0x14b   : > { %v1278_v4 = vadd.f32 %v1277_v2, %v1276_v0  ;;  %v1326_v5 = vadd.f32 %v1325_v3, %v1324_v1  ;;  %v640_v6 = vadd.f32 %v1275_v62, %v1774_v56  ;;  %v704_v7 = vadd.f32 %v1323_v63, %v1774_v56 }
 0x14d   : > { %v643_v8 = vadd.f32 %v1278_v4, %v1774_v56  ;;  %v707_v9 = vadd.f32 %v1326_v5, %v1774_v56 }
 0x14f   : > { %v1161_v10 = vpack.c.bf16 %v643_v8, %v640_v6  ;;  %v1201_v11 = vpack.c.bf16 %v707_v9, %v704_v7  ;;  %v1279_v12 = vpop.f32.mrb[20].mxu0  ;;  %v1327_v13 = vpop.f32.mrb[20].mxu1 }
 0x150   : > { %v1280_v14 = vpop.f32.mrb[21].mxu0  ;;  %v1328_v15 = vpop.f32.mrb[21].mxu1 }
 0x151   : > { %1221 = vst [vmem:[%s1783_s29 + $0x20] sm:$0xff] %v1161_v10   ;;  %1229 = vst [vmem:[%s1783_s29 + $0x60] sm:$0xff] %v1201_v11   ;;  %v1281_v16 = vadd.f32 %v1280_v14, %v1279_v12  ;;  %v1329_v17 = vadd.f32 %v1328_v15, %v1327_v13  ;;  %v1282_v18 = vpop.f32.mrb[22].mxu0  ;;  %v1330_v19 = vpop.f32.mrb[22].mxu1 }
 0x152   : > { %v1283_v20 = vpop.f32.mrb[23].mxu0  ;;  %v1331_v21 = vpop.f32.mrb[23].mxu1 }
 0x153   : > { %v1284_v22 = vadd.f32 %v1283_v20, %v1282_v18  ;;  %v1332_v23 = vadd.f32 %v1331_v21, %v1330_v19  ;;  %v648_v24 = vadd.f32 %v1281_v16, %v1774_v56  ;;  %v712_v25 = vadd.f32 %v1329_v17, %v1774_v56 }
 0x155   : > { %v651_v26 = vadd.f32 %v1284_v22, %v1774_v56  ;;  %v715_v27 = vadd.f32 %v1332_v23, %v1774_v56 }
 0x157   : > { %v1166_v28 = vpack.c.bf16 %v651_v26, %v648_v24  ;;  %v1206_v29 = vpack.c.bf16 %v715_v27, %v712_v25  ;;  %v1285_v30 = vpop.f32.mrb[24].mxu0  ;;  %v1333_v31 = vpop.f32.mrb[24].mxu1 }
 0x158   : > { %v1286_v32 = vpop.f32.mrb[25].mxu0  ;;  %v1334_v33 = vpop.f32.mrb[25].mxu1 }
 0x159   : > { %1222 = vst [vmem:[%s1783_s29 + $0x28] sm:$0xff] %v1166_v28   ;;  %1230 = vst [vmem:[%s1783_s29 + $0x68] sm:$0xff] %v1206_v29   ;;  %v1287_v34 = vadd.f32 %v1286_v32, %v1285_v30  ;;  %v1335_v35 = vadd.f32 %v1334_v33, %v1333_v31  ;;  %v1288_v36 = vpop.f32.mrb[26].mxu0  ;;  %v1336_v37 = vpop.f32.mrb[26].mxu1 }
 0x15a   : > { %v1289_v38 = vpop.f32.mrb[27].mxu0  ;;  %v1337_v39 = vpop.f32.mrb[27].mxu1 }
 0x15b   : > { %v1290_v40 = vadd.f32 %v1289_v38, %v1288_v36  ;;  %v1338_v41 = vadd.f32 %v1337_v39, %v1336_v37  ;;  %v656_v42 = vadd.f32 %v1287_v34, %v1774_v56  ;;  %v720_v43 = vadd.f32 %v1335_v35, %v1774_v56 }
 0x15d   : > { %v659_v44 = vadd.f32 %v1290_v40, %v1774_v56  ;;  %v723_v45 = vadd.f32 %v1338_v41, %v1774_v56 }
 0x15f   : > { %v1171_v46 = vpack.c.bf16 %v659_v44, %v656_v42  ;;  %v1211_v47 = vpack.c.bf16 %v723_v45, %v720_v43  ;;  %v1291_v48 = vpop.f32.mrb[28].mxu0  ;;  %v1339_v49 = vpop.f32.mrb[28].mxu1 }
 0x160   : > { %v1292_v50 = vpop.f32.mrb[29].mxu0  ;;  %v1340_v51 = vpop.f32.mrb[29].mxu1 }
 0x161   : > { %1223 = vst [vmem:[%s1783_s29 + $0x30] sm:$0xff] %v1171_v46   ;;  %1231 = vst [vmem:[%s1783_s29 + $0x70] sm:$0xff] %v1211_v47   ;;  %v1293_v52 = vadd.f32 %v1292_v50, %v1291_v48  ;;  %v1341_v53 = vadd.f32 %v1340_v51, %v1339_v49  ;;  %v1294_v54 = vpop.f32.mrb[30].mxu0  ;;  %v1342_v55 = vpop.f32.mrb[30].mxu1 }
 0x162   : > { %v1295_v57 = vpop.f32.mrb[31].mxu0  ;;  %v1343_v58 = vpop.f32.mrb[31].mxu1 }
 0x163   : > { %v1296_v59 = vadd.f32 %v1295_v57, %v1294_v54  ;;  %v1344_v60 = vadd.f32 %v1343_v58, %v1342_v55  ;;  %v664_v61 = vadd.f32 %v1293_v52, %v1774_v56  ;;  %v728_v62 = vadd.f32 %v1341_v53, %v1774_v56 }
 0x165   : > { %v667_v63 = vadd.f32 %v1296_v59, %v1774_v56  ;;  %v731_v0 = vadd.f32 %v1344_v60, %v1774_v56 }
 0x167   : > { %v1176_v1 = vpack.c.bf16 %v667_v63, %v664_v61  ;;  %v1216_v2 = vpack.c.bf16 %v731_v0, %v728_v62 }
 0x169   : > { %1224 = vst [vmem:[%s1783_s29 + $0x38] sm:$0xff] %v1176_v1   ;;  %1232 = vst [vmem:[%s1783_s29 + $0x78] sm:$0xff] %v1216_v2  }
 0x16a PF: > { %s16_s17 = sadd.s32 1, %s1562_s17   ;;  %s1854_s12 = smov %s1546_s13 }
 0x16b   : > { %p13_p9 = scmp.ge.s32.totalorder %s16_s17, 4   ;;  %s1855_s13 = smov %s1550_s14 }
 0x16c   : > { %s1856_s14 = smov %s1636_s24  ;;  %s1857_s15 = smov %s1558_s16 }
 0x16d   : > { %s1858_s16 = smov %s1860_s19  ;;  %15 = sbr.rel (!%p13_p9) target bundleno = 4 (0x4), region = 78 }
 0x174   :  { %922 = vsyncpa [#allocation3], 1 }
 0x175   :  { %924 = vsyncpa [#allocation3 + $0x1], 1 }

</bundles_post_ra>
